<compile_context>
chip_gen: v5e
topology: v5e:2x2
jax: 0.10.0
libtpu: 0.0.40
codegen_flags: <defaults>
</compile_context>

<pallas_src>
import jax
import jax.numpy as jnp
from jax import lax
from jax.experimental import pallas as pl
from jax.experimental.pallas import tpu as pltpu


def mlp_kernel(x_ref, w1_ref, b1_ref, w2_ref, b2_ref, o_ref):
    # x_ref : (TM, D_in)   bf16  batch tile
    # w1_ref: (H1, D_in)   bf16  PyTorch layout (NOT transposed)
    # b1_ref: (1, H1)      f32
    # w2_ref: (D_out, H1)  bf16  PyTorch layout (NOT transposed)
    # b2_ref: (1, D_out)   f32
    # o_ref : (TM, D_out)  f32
    x = x_ref[...]
    w1 = w1_ref[...]
    w2 = w2_ref[...]

    # Layer 1: x @ W1^T done natively by contracting feature dims (no transpose
    # materialized); accumulate in f32 on the MXU.
    h = lax.dot_general(
        x, w1,
        dimension_numbers=(((1,), (1,)), ((), ())),
        preferred_element_type=jnp.float32,
    )
    h = jnp.tanh(h + b1_ref[...])                       # f32 bias + EUP tanh

    # Layer 2: same contraction pattern against untransposed W2.
    y = lax.dot_general(
        h.astype(w2.dtype), w2,
        dimension_numbers=(((1,), (1,)), ((), ())),
        preferred_element_type=jnp.float32,
    )
    o_ref[...] = jax.nn.sigmoid(y + b2_ref[...]).astype(o_ref.dtype)


def mlp_forward(x, w1, b1, w2, b2, *, block_m=256):
    """x: (B, D_in) f32. w1: (H1, D_in), w2: (D_out, H1) — PyTorch nn.Linear layout."""
    B, D_in = x.shape
    H1 = w1.shape[0]
    D_out = w2.shape[0]

    # bf16 matmul operands; f32 biases (kept 2-D so they live as VMEM tiles).
    x_bf = jnp.asarray(x, jnp.bfloat16)
    w1_bf = jnp.asarray(w1, jnp.bfloat16)
    w2_bf = jnp.asarray(w2, jnp.bfloat16)
    b1_2d = jnp.asarray(b1, jnp.float32).reshape(1, H1)
    b2_2d = jnp.asarray(b2, jnp.float32).reshape(1, D_out)

    # Batch tile: multiple of 8 sublanes, capped at block_m; full batch if small.
    tm = min(block_m, max(8, ((B + 7) // 8) * 8))
    grid = (pl.cdiv(B, tm),)

    flops = 2 * B * (D_in * H1 + H1 * D_out)
    transcendentals = B * (H1 + D_out)
    bytes_accessed = (
        x_bf.size * 2 + w1_bf.size * 2 + w2_bf.size * 2
        + b1_2d.size * 4 + b2_2d.size * 4 + B * D_out * 4
    )

    return pl.pallas_call(
        mlp_kernel,
        out_shape=jax.ShapeDtypeStruct((B, D_out), jnp.float32),
        grid=grid,
        in_specs=[
            pl.BlockSpec((tm, D_in), lambda i: (i, 0)),      # batch-tiled x
            pl.BlockSpec((H1, D_in), lambda i: (0, 0)),      # W1 resident in VMEM
            pl.BlockSpec((1, H1), lambda i: (0, 0)),         # b1 resident
            pl.BlockSpec((D_out, H1), lambda i: (0, 0)),     # W2 resident
            pl.BlockSpec((1, D_out), lambda i: (0, 0)),      # b2 resident
        ],
        out_specs=pl.BlockSpec((tm, D_out), lambda i: (i, 0)),
        compiler_params=pltpu.CompilerParams(
            dimension_semantics=("parallel",),               # megacore-shardable batch axis
        ),
        cost_estimate=pl.CostEstimate(
            flops=flops,
            transcendentals=transcendentals,
            bytes_accessed=bytes_accessed,
        ),
    )(x_bf, w1_bf, b1_2d, w2_bf, b2_2d)


def xavier_uniform(key, shape):
    """Matches torch.nn.init.xavier_uniform_ for a (fan_out, fan_in) weight."""
    fan_out, fan_in = shape
    limit = jnp.sqrt(6.0 / (fan_in + fan_out))
    return jax.random.uniform(key, shape, jnp.float32, -limit, limit)


if __name__ == "__main__":
    # Small shapes consistent with the module's forward.
    batch = 8
    input_shape = 32
    hidden_1_shape = 64
    hidden_2_shape = 48   # unused by the module's forward (no layer consumes it)
    output_shape = 16

    key = jax.random.PRNGKey(0)
    k_x, k_w1, k_w2 = jax.random.split(key, 3)

    x = jax.random.normal(k_x, (batch, input_shape), jnp.float32)

    # Deterministic parameter init mirroring the module's __init__:
    # xavier_uniform_ on weights, zeros_ on biases.
    w1 = xavier_uniform(k_w1, (hidden_1_shape, input_shape))   # hid1.weight
    b1 = jnp.zeros((hidden_1_shape,), jnp.float32)             # hid1.bias
    w2 = xavier_uniform(k_w2, (output_shape, hidden_1_shape))  # oupt.weight
    b2 = jnp.zeros((output_shape,), jnp.float32)               # oupt.bias

    out = mlp_forward(x, w1, b1, w2, b2)
    out = jax.block_until_ready(out)

    # Pure-JAX f32 reference of the same math; tolerance covers bf16 matmul operands.
    ref = jax.nn.sigmoid(jnp.tanh(x @ w1.T + b1) @ w2.T + b2)
    assert out.shape == (batch, output_shape)
    assert jnp.allclose(out, ref, atol=2e-2, rtol=2e-2), float(jnp.max(jnp.abs(out - ref)))

    print("KERNEL_OK")
</pallas_src>

<mosaic_0001>
module attributes {stable_mosaic.version = 11 : i64} {
  func.func @mlp_kernel(%arg0: i32, %arg1: memref<8x32xbf16, #tpu.memory_space<vmem>>, %arg2: memref<64x32xbf16, #tpu.memory_space<vmem>>, %arg3: memref<1x64xf32, #tpu.memory_space<vmem>>, %arg4: memref<16x64xbf16, #tpu.memory_space<vmem>>, %arg5: memref<1x16xf32, #tpu.memory_space<vmem>>, %arg6: memref<8x16xf32, #tpu.memory_space<vmem>>) attributes {dimension_semantics = [#tpu.dimension_semantics<parallel>], iteration_bounds = array<i64: 1>, scalar_prefetch = 0 : i64, scratch_operands = 0 : i64, tpu.core_type = #tpu.core_type<tc>, window_params = [{transform_indices = @transform_0, window_bounds = array<i64: 8, 32>}, {pipeline_mode = #tpu.pipeline_mode<synchronous>, transform_indices = @transform_1, window_bounds = array<i64: 64, 32>}, {pipeline_mode = #tpu.pipeline_mode<synchronous>, transform_indices = @transform_2, window_bounds = array<i64: 1, 64>}, {pipeline_mode = #tpu.pipeline_mode<synchronous>, transform_indices = @transform_3, window_bounds = array<i64: 16, 64>}, {pipeline_mode = #tpu.pipeline_mode<synchronous>, transform_indices = @transform_4, window_bounds = array<i64: 1, 16>}, {transform_indices = @transform_5, window_bounds = array<i64: 8, 16>}]} {
    %c0 = arith.constant 0 : index
    %c0_0 = arith.constant 0 : index
    %0 = vector.load %arg1[%c0, %c0_0] : memref<8x32xbf16, #tpu.memory_space<vmem>>, vector<8x32xbf16>
    %c0_1 = arith.constant 0 : index
    %c0_2 = arith.constant 0 : index
    %1 = vector.load %arg2[%c0_1, %c0_2] : memref<64x32xbf16, #tpu.memory_space<vmem>>, vector<64x32xbf16>
    %c0_3 = arith.constant 0 : index
    %c0_4 = arith.constant 0 : index
    %2 = vector.load %arg4[%c0_3, %c0_4] : memref<16x64xbf16, #tpu.memory_space<vmem>>, vector<16x64xbf16>
    %cst = arith.constant dense<0.000000e+00> : vector<8x64xf32>
    %3 = tpu.matmul %0, %1, %cst {dimension_numbers = #tpu.dot_dimension_numbers<[1], [1], [0], [0], [0, 0, 1, 0], [], []>} : vector<8x32xbf16>, vector<64x32xbf16>, vector<8x64xf32> -> vector<8x64xf32>
    %c0_5 = arith.constant 0 : index
    %c0_6 = arith.constant 0 : index
    %4 = vector.load %arg3[%c0_5, %c0_6] : memref<1x64xf32, #tpu.memory_space<vmem>>, vector<1x64xf32>
    %5 = vector.broadcast %4 : vector<1x64xf32> to vector<8x64xf32>
    %6 = arith.addf %3, %5 : vector<8x64xf32>
    %7 = math.tanh %6 : vector<8x64xf32>
    %8 = arith.truncf %7 : vector<8x64xf32> to vector<8x64xbf16>
    %cst_7 = arith.constant dense<0.000000e+00> : vector<8x16xf32>
    %9 = tpu.matmul %8, %2, %cst_7 {dimension_numbers = #tpu.dot_dimension_numbers<[1], [1], [0], [0], [0, 0, 1, 0], [], []>} : vector<8x64xbf16>, vector<16x64xbf16>, vector<8x16xf32> -> vector<8x16xf32>
    %c0_8 = arith.constant 0 : index
    %c0_9 = arith.constant 0 : index
    %10 = vector.load %arg5[%c0_8, %c0_9] : memref<1x16xf32, #tpu.memory_space<vmem>>, vector<1x16xf32>
    %11 = vector.broadcast %10 : vector<1x16xf32> to vector<8x16xf32>
    %12 = arith.addf %9, %11 : vector<8x16xf32>
    %13 = arith.negf %12 : vector<8x16xf32>
    %14 = math.exp %13 : vector<8x16xf32>
    %cst_10 = arith.constant 1.000000e+00 : f32
    %15 = vector.broadcast %cst_10 : f32 to vector<8x16xf32>
    %16 = arith.addf %15, %14 : vector<8x16xf32>
    %17 = arith.divf %15, %16 : vector<8x16xf32>
    %c0_11 = arith.constant 0 : index
    %c0_12 = arith.constant 0 : index
    %18 = vector.load %arg6[%c0_11, %c0_12] : memref<8x16xf32, #tpu.memory_space<vmem>>, vector<8x16xf32>
    tpu.vector_store %arg6[%c0_11, %c0_12], %17 {strides = array<i32>} : memref<8x16xf32, #tpu.memory_space<vmem>>, vector<8x16xf32>,
    return
  }
  func.func @transform_0(%arg0: i32) -> (i32, i32) {
    %c0_i32 = arith.constant 0 : i32
    %c0_i32_0 = arith.constant 0 : i32
    return %arg0, %c0_i32 : i32, i32
  }
  func.func @transform_1(%arg0: i32) -> (i32, i32) {
    %c0_i32 = arith.constant 0 : i32
    %c0_i32_0 = arith.constant 0 : i32
    %c0_i32_1 = arith.constant 0 : i32
    return %c0_i32, %c0_i32_0 : i32, i32
  }
  func.func @transform_2(%arg0: i32) -> (i32, i32) {
    %c0_i32 = arith.constant 0 : i32
    %c0_i32_0 = arith.constant 0 : i32
    %c0_i32_1 = arith.constant 0 : i32
    return %c0_i32, %c0_i32_0 : i32, i32
  }
  func.func @transform_3(%arg0: i32) -> (i32, i32) {
    %c0_i32 = arith.constant 0 : i32
    %c0_i32_0 = arith.constant 0 : i32
    %c0_i32_1 = arith.constant 0 : i32
    return %c0_i32, %c0_i32_0 : i32, i32
  }
  func.func @transform_4(%arg0: i32) -> (i32, i32) {
    %c0_i32 = arith.constant 0 : i32
    %c0_i32_0 = arith.constant 0 : i32
    %c0_i32_1 = arith.constant 0 : i32
    return %c0_i32, %c0_i32_0 : i32, i32
  }
  func.func @transform_5(%arg0: i32) -> (i32, i32) {
    %c0_i32 = arith.constant 0 : i32
    %c0_i32_0 = arith.constant 0 : i32
    return %arg0, %c0_i32 : i32, i32
  }
}

</mosaic_0001>

<bundles_post_ra>
// kernel: tpu_custom_call.1
= control target key start
LH: loop header
LB: loop body
LE: loop exit
PB: predicated region body
PF: predicated region fallthrough
CT: control target
= control target key end

     0   :  { %vm57_vm0 = vcmask 261120   ;;  %s275_s0 = inlined_call_operand.vmem [shape: bf16[8,32], index: 0, kind: input, shape index: {}]   ;;  %s276_s1 = inlined_call_operand.vmem [shape: bf16[64,32], index: 1, kind: input, shape index: {}]   ;;  %s277_s2 = inlined_call_operand.vmem [shape: f32[1,64], index: 2, kind: input, shape index: {}]   ;;  %s278_s3 = inlined_call_operand.vmem [shape: bf16[16,64], index: 3, kind: input, shape index: {}]   ;;  %s279_s4 = inlined_call_operand.vmem [shape: f32[1,16], index: 4, kind: input, shape index: {}]   ;;  %s280_s5 = inlined_call_operand.hbm [shape: f32[8,16], index: 5, kind: output, shape index: {}]  }
   0x1   :  { %v180_v0 = vld [vmem:[%s276_s1 + $0x18] sm:$0xff] }
   0x2   :  { %v71_v1 = vsel %vm57_vm0, %v180_v0, 0 }
   0x3   :  { %77 = vmatpush.bf16.xpose.msra.mxu0 %v71_v1 }
   0x4   :  { %10 = vsyncpa [#allocation3], 0  ;;  %v179_v2 = vld [vmem:[%s276_s1 + $0x10] sm:$0xff]  ;;  %v178_v4 = vld [vmem:[%s276_s1 + $0x8] sm:$0xff]  ;;  %vm97_vm1 = vcmask 523264   ;;  %vm136_vm5 = vcmask 130048  }
   0x5   :  { %v68_v3 = vsel %vm57_vm0, %v179_v2, 0  ;;  %v65_v5 = vsel %vm57_vm0, %v178_v4, 0  ;;  %v177_v6 = vld [vmem:[%s276_s1] sm:$0xff] }
   0x6   :  { %v62_v7 = vsel %vm57_vm0, %v177_v6, 0  ;;  %v22_v8 = vld [vmem:[%s275_s0] sm:$0xf] }
   0x7   :  { %v181_v9 = vld [vmem:[%s278_s3] sm:$0xff] }
   0x8   :  { %v102_v10 = vsel %vm97_vm1, %v181_v9, 0  ;;  %v183_v11 = vld [vmem:[%s277_s2] ss:$0 sm:$0xff]  ;;  %s217_s2 = smov [#allocation2]  }
   0x9   :  { %111 = vmatpush.bf16.xpose.msra.mxu1 %v102_v10  ;;  %v184_v17 = vld [vmem:[%s279_s4] ss:$0 sm:$0xff]  ;;  %s143_s3 = sshll.u32 %s217_s2, 4  ;;  %s145_s4 = sshll.u32 %s280_s5, 4  ;;  %s144_s3 = int_to_ptr.vmem [resolvable:$true] %s143_s3  ;;  %s146_s4 = int_to_ptr.hbm [resolvable:$true] %s145_s4 }
   0xb   :  { %78 = vmatpush.bf16.xpose.msra.mxu0 %v68_v3 }
  0x13   :  { %79 = vmatpush.bf16.xpose.msra.mxu0 %v65_v5 }
  0x1b   :  { %80 = vmatpush.bf16.xpose.msra.mxu0 %v62_v7 }
  0x22   :  { %170 = vmatmul.msk.bf16.vlgmr.msra.gmra.mxu0 %vm57_vm0, %v22_v8 }
  0x9f   :  { %v82_v12 = vpop.f32.mrf.mxu0 }
  0xa0   :  { %v83_v13 = vadd.f32 %v183_v11, %v82_v12 }
  0xa2   :  { %185 = vtanh.f32 %v83_v13 }
  0xa7   :  { %v84_v14 = vpop.f32.mrf.mxu0 }
  0xa8   :  { %v186_v15 = vpop.eup %185 }
  0xa9   :  { %v87_v16 = vpack.c.bf16 %v186_v15, %v186_v15 }
  0xab   :  { %175 = vmatmul.msk.bf16.vlgmr.msra.gmra.mxu1 %vm97_vm1, %v87_v16 }
 0x128   :  { %v113_v18 = vpop.f32.mrf.mxu1 }
 0x129   :  { %v114_v19 = vadd.f32 %v184_v17, %v113_v18 }
 0x12b   :  { %v176_v20 = vmul.f32 -1.442695, %v114_v19 }
 0x12d   :  { %187 = vpow2.f32 %v176_v20 }
 0x130   :  { %v115_v21 = vpop.f32.mrf.mxu1 }
 0x133   :  { %v188_v22 = vpop.eup %187 }
 0x134   :  { %v120_v23 = vadd.f32 1.0, %v188_v22 }
 0x136   :  { %189 = vrcp.f32 %v120_v23  ;;  %v132_v27 = vand.u32 2147483648, %v120_v23  ;;  %v130_v29 = vand.u32 2147483647, %v120_v23  ;;  %vm126_vm3 = vweird.f32 %v120_v23 }
 0x138   :  { %v133_v31 = vor.u32 1.1754944e-38, %v132_v27  ;;  %vm131_vm6 = vcmp.eq.f32.partialorder %v130_v29, 8.507059e+37 }
 0x13c   :  { %v190_v24 = vpop.eup %189 }
 0x13d   :  { %v122_v25 = vmul.f32 %v190_v24, %v120_v23  ;;  %vm127_vm2 = vweird.f32 %v190_v24 }
 0x13e   :  { %vm128_vm4 = vmor %vm126_vm3, %vm127_vm2 }
 0x13f   :  { %v123_v26 = vsub.f32 1.0, %v122_v25 }
 0x141   :  { %v124_v28 = vmul.f32 %v190_v24, %v123_v26 }
 0x143   :  { %v125_v30 = vadd.f32 %v190_v24, %v124_v28 }
 0x145   :  { %v129_v32 = vsel %vm128_vm4, %v190_v24, %v125_v30 }
 0x146   :  { %v134_v33 = vsel %vm131_vm6, %v133_v31, %v129_v32 }
 0x147   :  { %137 = vst.msk [vmem:[#allocation2] sm:$0xff] %vm136_vm5, %v134_v33 }
 0x148   :  { %148 = dma.vmem_to_hbm [thread:$0]  %s144_s3, 128, %s146_s4, [#allocation3]  }
 0x149   :  { %215 = dma.done.wait [#allocation3], 128  }
 0x14a   :  { %216 = vsyncadd [#allocation3], 4294967168 }
 0x14b   :  { %153 = vsyncpa [#allocation3], 1 }

</bundles_post_ra>
